<compile_context>
chip_gen: v6e
topology: v6e:2x2x1
jax: 0.10.0
libtpu: 0.0.40
codegen_flags: <defaults>
</compile_context>

<pallas_src>
import functools

import jax
import jax.numpy as jnp
import numpy as np
from jax import lax
from jax.experimental import pallas as pl
from jax.experimental.pallas import tpu as pltpu


def _round_up(v, m):
    return (v + m - 1) // m * m


def _vmem_capacity_bytes():
    """Physical VMEM per core; conservative v7x fallback (64 MiB)."""
    try:
        info = pltpu.get_tpu_info()
        cap = getattr(info, "vmem_capacity_bytes", None)
        if cap:
            return int(cap)
    except Exception:
        pass
    return 64 * 1024 * 1024


_VMEM_BYTES = _vmem_capacity_bytes()


def _make_kernel(cache_x):
    """Two-phase kernel over node tiles.

    phase 0          : accumulate per-graph feature sums + node counts
                       (and optionally stash the x tile in VMEM).
    phase 1, t == 0  : mean -> tanh(mean @ W) -> store transposed context.
    phase 1, all t   : S = x @ c.T on the MXU, fold sigmoid(S.T) into the
                       graph-major one-hot, add-pool straight into the
                       resident output block.
    """

    def kernel(x_ref, brow_ref, w_ref, out_ref,
               sums_ref, counts_ref, ct_ref, *maybe_xcache):
        phase = pl.program_id(0)
        t = pl.program_id(1)

        B_pad = out_ref.shape[0]
        tile = x_ref.shape[0]

        @pl.when((phase == 0) & (t == 0))
        def _init():
            sums_ref[...] = jnp.zeros_like(sums_ref)
            counts_ref[...] = jnp.zeros_like(counts_ref)
            out_ref[...] = jnp.zeros_like(out_ref)

        # Graph-major one-hot [B_pad, tile]; used by both phases.  Padded
        # nodes carry an out-of-range id so their column is all zeros.
        gid = lax.broadcasted_iota(jnp.int32, (B_pad, tile), 0)
        oh_gm = (brow_ref[...] == gid).astype(jnp.float32)

        @pl.when(phase == 0)
        def _phase_pool():
            x = x_ref[...]                                    # [tile, C_pad]
            # Segment sum as one_hot @ x (MXU-native, no transposes).
            sums_ref[...] += jnp.dot(oh_gm, x,
                                     preferred_element_type=jnp.float32)
            # Counts via a cheap lane reduce of the same one-hot.
            counts_ref[...] += jnp.sum(oh_gm, axis=1, keepdims=True)
            if cache_x:
                start = pl.multiple_of(t * tile, tile)
                maybe_xcache[0][pl.ds(start, tile), :] = x

        @pl.when(phase == 1)
        def _phase_attend():
            @pl.when(t == 0)
            def _context():
                # Exact division: one-off [B_pad, C_pad] op, keeps ~1e-6
                # agreement with the reference (approx recip cost accuracy).
                mean = sums_ref[...] / jnp.maximum(counts_ref[...], 1.0)
                c = jnp.tanh(jnp.dot(mean, w_ref[...],
                                     preferred_element_type=jnp.float32))
                ct_ref[...] = c.T                             # [C_pad, B_pad]

            if cache_x:
                start = pl.multiple_of(t * tile, tile)
                x = maybe_xcache[0][pl.ds(start, tile), :]    # VMEM-resident
            else:
                x = x_ref[...]                                # streamed again

            # Scores of every node vs every graph context (MXU, K = C_pad).
            s_all = jnp.dot(x, ct_ref[...],
                            preferred_element_type=jnp.float32)  # [tile, B_pad]
            # Tiny XLU transpose; fold the sigmoid weight into the one-hot
            # instead of scaling the full [tile, C_pad] x block.
            s_gm = s_all.T                                       # [B_pad, tile]
            oh_scaled = oh_gm * jax.nn.sigmoid(s_gm)
            out_ref[...] += jnp.dot(oh_scaled, x,
                                    preferred_element_type=jnp.float32)

    return kernel


@functools.partial(jax.jit, static_argnames=("num_graphs", "tile_n"))
def context_based_attention(x, batch, weight_c, num_graphs, *, tile_n=None):
    """x: [N, C] f32, batch: [N] int (graph id in [0, B)), weight_c: [C, C].

    Returns h: [B, C] f32.  Nodes with a batch id outside [0, B) contribute
    nothing (same as the scatter-add reference).
    """
    N, C = x.shape
    B = int(num_graphs)

    # Lane/sublane-dense padding.
    C_pad = _round_up(max(C, 1), 128)
    B_pad = _round_up(max(B, 1), 8)
    f32 = 4

    # Generation-aware VMEM budget (v7x: 64 MiB physical, v5e/v6e: 128 MiB).
    budget = min(int(_VMEM_BYTES * 0.75), _VMEM_BYTES - (8 << 20))

    # Static VMEM footprint (double-buffered W, resident out, scratch).
    fixed = (2 * C_pad * C_pad * f32            # W (double buffered)
             + B_pad * C_pad * f32              # resident output block
             + B_pad * C_pad * f32              # segment sums scratch
             + B_pad * 128 * f32                # counts scratch (lane-padded)
             + C_pad * max(B_pad, 128) * f32)   # transposed-context scratch

    def per_tile(tile):
        # x tile + batch-row block, each double buffered (row pads to 8 subl).
        return 2 * tile * C_pad * f32 + 2 * 8 * tile * f32

    n_cap = _round_up(max(N, 1), 128)
    if tile_n is not None:
        tile = min(_round_up(int(tile_n), 128), n_cap)
    else:
        cands = sorted({c for c in (2048, 1024, 512, 256, 128, n_cap)
                        if c <= n_cap}, reverse=True)
        tile = 128
        for cand in cands:
            if fixed + per_tile(cand) <= budget // 2:
                tile = cand
                break
    tile = max(tile, 128)

    N_pad = _round_up(max(N, 1), tile)
    num_tiles = N_pad // tile

    # VMEM-resident x fast path (halves HBM traffic) when it fits the budget.
    xcache_bytes = N_pad * C_pad * f32
    cache_x = (fixed + per_tile(tile) + xcache_bytes) <= int(budget * 0.8)

    x_p = jnp.zeros((N_pad, C_pad), jnp.float32).at[:N, :C].set(
        x.astype(jnp.float32))
    w_p = jnp.zeros((C_pad, C_pad), jnp.float32).at[:C, :C].set(
        weight_c.astype(jnp.float32))
    # Pad batch with an out-of-range id so padded nodes match no graph.
    b_row = jnp.full((1, N_pad), B_pad, jnp.int32).at[0, :N].set(
        batch.astype(jnp.int32))

    if cache_x:
        # Phase 1 reads x from the VMEM scratch; pin block 0 so no re-stream.
        x_map = lambda p, t: (t * (1 - p), 0)
    else:
        x_map = lambda p, t: (t, 0)

    scratch_shapes = [
        pltpu.VMEM((B_pad, C_pad), jnp.float32),   # segment sums
        pltpu.VMEM((B_pad, 1), jnp.float32),       # segment counts
        pltpu.VMEM((C_pad, B_pad), jnp.float32),   # transposed context
    ]
    if cache_x:
        scratch_shapes.append(pltpu.VMEM((N_pad, C_pad), jnp.float32))

    out = pl.pallas_call(
        _make_kernel(cache_x),
        out_shape=jax.ShapeDtypeStruct((B_pad, C_pad), jnp.float32),
        grid_spec=pltpu.PrefetchScalarGridSpec(
            num_scalar_prefetch=0,
            grid=(2, num_tiles),                                  # (phase, tile)
            in_specs=[
                pl.BlockSpec((tile, C_pad), x_map),                 # x
                pl.BlockSpec((1, tile), lambda p, t: (0, t)),       # batch row
                pl.BlockSpec((C_pad, C_pad), lambda p, t: (0, 0)),  # W
            ],
            out_specs=pl.BlockSpec((B_pad, C_pad), lambda p, t: (0, 0)),
            scratch_shapes=scratch_shapes,
        ),
        compiler_params=pltpu.CompilerParams(
            dimension_semantics=("arbitrary", "arbitrary"),
            vmem_limit_bytes=int(budget),
        ),
    )(x_p, b_row, w_p)

    return out[:B, :C]


def _reference(x, batch, weight_c, num_graphs):
    B = int(num_graphs)
    N, C = x.shape
    sums = jnp.zeros((B, C), jnp.float32).at[batch].add(x)
    counts = jnp.zeros((B,), jnp.float32).at[batch].add(1.0)
    mean = sums / jnp.maximum(counts, 1.0)[:, None]
    c = jnp.tanh(mean @ weight_c)
    c_nodes = c[batch]
    s = jax.nn.sigmoid(jnp.sum(x * c_nodes, axis=1))
    return jnp.zeros((B, C), jnp.float32).at[batch].add(s[:, None] * x)


if __name__ == "__main__":
    key = jax.random.PRNGKey(0)
    k_x, k_w, k_p = jax.random.split(key, 3)

    N, C, B = 16, 32, 4                       # nodes, channels, graphs
    x = jax.random.normal(k_x, (N, C), dtype=jnp.float32)
    # 4 nodes per graph, then permuted -> exercises the unsorted-batch path.
    batch = jnp.repeat(jnp.arange(B, dtype=jnp.int32), N // B)
    batch = jax.random.permutation(k_p, batch)
    # deterministic init of the [C, C] weight (module leaves it uninitialized)
    weight_c = jax.random.normal(k_w, (C, C), dtype=jnp.float32) * 0.1

    h = context_based_attention(x, batch, weight_c, num_graphs=B)
    h = jax.block_until_ready(h)

    ref = _reference(x, batch, weight_c, B)
    assert h.shape == (B, C)
    # exact (non-approx) mean reciprocal -> tight agreement with reference
    assert np.allclose(np.asarray(h), np.asarray(ref), atol=1e-4, rtol=1e-4)

    print("KERNEL_OK")
</pallas_src>

<mosaic_0001>
module attributes {stable_mosaic.version = 11 : i64} {
  func.func @kernel(%arg0: i32, %arg1: i32, %arg2: memref<128x128xf32, #tpu.memory_space<vmem>>, %arg3: memref<1x128xi32, #tpu.memory_space<vmem>>, %arg4: memref<128x128xf32, #tpu.memory_space<vmem>>, %arg5: memref<8x128xf32, #tpu.memory_space<vmem>>, %arg6: memref<8x128xf32, #tpu.memory_space<vmem>>, %arg7: memref<8x1xf32, #tpu.memory_space<vmem>>, %arg8: memref<128x8xf32, #tpu.memory_space<vmem>>, %arg9: memref<128x128xf32, #tpu.memory_space<vmem>>) attributes {dimension_semantics = [#tpu.dimension_semantics<arbitrary>, #tpu.dimension_semantics<arbitrary>], iteration_bounds = array<i64: 2, 1>, scalar_prefetch = 0 : i64, scratch_operands = 4 : i64, tpu.core_type = #tpu.core_type<tc>, window_params = [{transform_indices = @transform_0, window_bounds = array<i64: 128, 128>}, {transform_indices = @transform_1, window_bounds = array<i64: 1, 128>}, {pipeline_mode = #tpu.pipeline_mode<synchronous>, transform_indices = @transform_2, window_bounds = array<i64: 128, 128>}, {pipeline_mode = #tpu.pipeline_mode<synchronous>, transform_indices = @transform_3, window_bounds = array<i64: 8, 128>}]} {
    %c0_i32 = arith.constant 0 : i32
    %0 = arith.cmpi eq, %arg0, %c0_i32 : i32
    %c0_i32_0 = arith.constant 0 : i32
    %1 = arith.cmpi eq, %arg1, %c0_i32_0 : i32
    %2 = arith.andi %0, %1 : i1
    %3 = arith.extui %2 : i1 to i32
    %c0_i32_1 = arith.constant 0 : i32
    %4 = arith.cmpi ne, %3, %c0_i32_1 : i32
    scf.if %4 {
      %cst = arith.constant 0.000000e+00 : f32
      %17 = vector.broadcast %cst : f32 to vector<8x128xf32>
      %c0_6 = arith.constant 0 : index
      %c0_7 = arith.constant 0 : index
      %18 = vector.load %arg6[%c0_6, %c0_7] : memref<8x128xf32, #tpu.memory_space<vmem>>, vector<8x128xf32>
      tpu.vector_store %arg6[%c0_6, %c0_7], %17 {strides = array<i32>} : memref<8x128xf32, #tpu.memory_space<vmem>>, vector<8x128xf32>,
      %cst_8 = arith.constant 0.000000e+00 : f32
      %19 = vector.broadcast %cst_8 : f32 to vector<8x1xf32>
      %c0_9 = arith.constant 0 : index
      %c0_10 = arith.constant 0 : index
      %20 = vector.load %arg7[%c0_9, %c0_10] : memref<8x1xf32, #tpu.memory_space<vmem>>, vector<8x1xf32>
      tpu.vector_store %arg7[%c0_9, %c0_10], %19 {strides = array<i32>} : memref<8x1xf32, #tpu.memory_space<vmem>>, vector<8x1xf32>,
      %cst_11 = arith.constant 0.000000e+00 : f32
      %21 = vector.broadcast %cst_11 : f32 to vector<8x128xf32>
      %c0_12 = arith.constant 0 : index
      %c0_13 = arith.constant 0 : index
      %22 = vector.load %arg5[%c0_12, %c0_13] : memref<8x128xf32, #tpu.memory_space<vmem>>, vector<8x128xf32>
      tpu.vector_store %arg5[%c0_12, %c0_13], %21 {strides = array<i32>} : memref<8x128xf32, #tpu.memory_space<vmem>>, vector<8x128xf32>,
    } else {
    }
    %5 = tpu.iota {dimensions = array<i32: 0>} : vector<8x128xi32>
    %c0 = arith.constant 0 : index
    %c0_2 = arith.constant 0 : index
    %6 = vector.load %arg3[%c0, %c0_2] : memref<1x128xi32, #tpu.memory_space<vmem>>, vector<1x128xi32>
    %7 = vector.broadcast %6 : vector<1x128xi32> to vector<8x128xi32>
    %8 = arith.cmpi eq, %7, %5 : vector<8x128xi32>
    %9 = arith.extui %8 : vector<8x128xi1> to vector<8x128xi32>
    %10 = arith.sitofp %9 : vector<8x128xi32> to vector<8x128xf32>
    %c0_i32_3 = arith.constant 0 : i32
    %11 = arith.cmpi eq, %arg0, %c0_i32_3 : i32
    %12 = arith.extui %11 : i1 to i32
    %c0_i32_4 = arith.constant 0 : i32
    %13 = arith.cmpi ne, %12, %c0_i32_4 : i32
    scf.if %13 {
      %c0_6 = arith.constant 0 : index
      %c0_7 = arith.constant 0 : index
      %17 = vector.load %arg2[%c0_6, %c0_7] : memref<128x128xf32, #tpu.memory_space<vmem>>, vector<128x128xf32>
      %c0_8 = arith.constant 0 : index
      %c0_9 = arith.constant 0 : index
      %18 = vector.load %arg6[%c0_8, %c0_9] : memref<8x128xf32, #tpu.memory_space<vmem>>, vector<8x128xf32>
      %cst = arith.constant dense<0.000000e+00> : vector<8x128xf32>
      %19 = tpu.matmul %10, %17, %cst {dimension_numbers = #tpu.dot_dimension_numbers<[1], [0], [0], [1], [0, 0, 1, 1], [], []>} : vector<8x128xf32>, vector<128x128xf32>, vector<8x128xf32> -> vector<8x128xf32>
      %20 = arith.addf %18, %19 : vector<8x128xf32>
      %c0_10 = arith.constant 0 : index
      %c0_11 = arith.constant 0 : index
      %21 = vector.load %arg6[%c0_10, %c0_11] : memref<8x128xf32, #tpu.memory_space<vmem>>, vector<8x128xf32>
      tpu.vector_store %arg6[%c0_10, %c0_11], %20 {strides = array<i32>} : memref<8x128xf32, #tpu.memory_space<vmem>>, vector<8x128xf32>,
      %c0_12 = arith.constant 0 : index
      %c0_13 = arith.constant 0 : index
      %22 = vector.load %arg7[%c0_12, %c0_13] : memref<8x1xf32, #tpu.memory_space<vmem>>, vector<8x1xf32>
      %cst_14 = arith.constant dense<0.000000e+00> : vector<8xf32>
      %23 = vector.multi_reduction <add>, %10, %cst_14 [1] : vector<8x128xf32> to vector<8xf32>
      %24 = vector.shape_cast %23 : vector<8xf32> to vector<8x1xf32>
      %25 = arith.addf %22, %24 : vector<8x1xf32>
      %c0_15 = arith.constant 0 : index
      %c0_16 = arith.constant 0 : index
      %26 = vector.load %arg7[%c0_15, %c0_16] : memref<8x1xf32, #tpu.memory_space<vmem>>, vector<8x1xf32>
      tpu.vector_store %arg7[%c0_15, %c0_16], %25 {strides = array<i32>} : memref<8x1xf32, #tpu.memory_space<vmem>>, vector<8x1xf32>,
      %c128_i32 = arith.constant 128 : i32
      %27 = arith.muli %arg1, %c128_i32 : i32
      %28 = tpu.assume_multiple %27, 128 : i32
      %29 = arith.index_cast %28 : i32 to index
      %c0_17 = arith.constant 0 : index
      %30 = vector.load %arg9[%29, %c0_17] : memref<128x128xf32, #tpu.memory_space<vmem>>, vector<128x128xf32>
      tpu.vector_store %arg9[%29, %c0_17], %17 {strides = array<i32>} : memref<128x128xf32, #tpu.memory_space<vmem>>, vector<128x128xf32>,
    } else {
    }
    %c1_i32 = arith.constant 1 : i32
    %14 = arith.cmpi eq, %arg0, %c1_i32 : i32
    %15 = arith.extui %14 : i1 to i32
    %c0_i32_5 = arith.constant 0 : i32
    %16 = arith.cmpi ne, %15, %c0_i32_5 : i32
    scf.if %16 {
      %c0_i32_6 = arith.constant 0 : i32
      %17 = arith.cmpi eq, %arg1, %c0_i32_6 : i32
      %18 = arith.extui %17 : i1 to i32
      %c0_i32_7 = arith.constant 0 : i32
      %19 = arith.cmpi ne, %18, %c0_i32_7 : i32
      scf.if %19 {
        %c0_17 = arith.constant 0 : index
        %c0_18 = arith.constant 0 : index
        %37 = vector.load %arg6[%c0_17, %c0_18] : memref<8x128xf32, #tpu.memory_space<vmem>>, vector<8x128xf32>
        %c0_19 = arith.constant 0 : index
        %c0_20 = arith.constant 0 : index
        %38 = vector.load %arg7[%c0_19, %c0_20] : memref<8x1xf32, #tpu.memory_space<vmem>>, vector<8x1xf32>
        %cst_21 = arith.constant 1.000000e+00 : f32
        %39 = vector.broadcast %cst_21 : f32 to vector<8x1xf32>
        %40 = arith.maximumf %38, %39 : vector<8x1xf32>
        %41 = vector.broadcast %40 : vector<8x1xf32> to vector<8x128xf32>
        %42 = arith.divf %37, %41 : vector<8x128xf32>
        %c0_22 = arith.constant 0 : index
        %c0_23 = arith.constant 0 : index
        %43 = vector.load %arg4[%c0_22, %c0_23] : memref<128x128xf32, #tpu.memory_space<vmem>>, vector<128x128xf32>
        %cst_24 = arith.constant dense<0.000000e+00> : vector<8x128xf32>
        %44 = tpu.matmul %42, %43, %cst_24 {dimension_numbers = #tpu.dot_dimension_numbers<[1], [0], [0], [1], [0, 0, 1, 1], [], []>} : vector<8x128xf32>, vector<128x128xf32>, vector<8x128xf32> -> vector<8x128xf32>
        %45 = math.tanh %44 : vector<8x128xf32>
        %46 = tpu.transpose %45, [1, 0] : vector<8x128xf32> -> vector<128x8xf32>
        %c0_25 = arith.constant 0 : index
        %c0_26 = arith.constant 0 : index
        %47 = vector.load %arg8[%c0_25, %c0_26] : memref<128x8xf32, #tpu.memory_space<vmem>>, vector<128x8xf32>
        tpu.vector_store %arg8[%c0_25, %c0_26], %46 {strides = array<i32>} : memref<128x8xf32, #tpu.memory_space<vmem>>, vector<128x8xf32>,
      } else {
      }
      %c128_i32 = arith.constant 128 : i32
      %20 = arith.muli %arg1, %c128_i32 : i32
      %21 = tpu.assume_multiple %20, 128 : i32
      %22 = arith.index_cast %21 : i32 to index
      %c0_8 = arith.constant 0 : index
      %23 = vector.load %arg9[%22, %c0_8] : memref<128x128xf32, #tpu.memory_space<vmem>>, vector<128x128xf32>
      %c0_9 = arith.constant 0 : index
      %c0_10 = arith.constant 0 : index
      %24 = vector.load %arg8[%c0_9, %c0_10] : memref<128x8xf32, #tpu.memory_space<vmem>>, vector<128x8xf32>
      %cst = arith.constant dense<0.000000e+00> : vector<128x8xf32>
      %25 = tpu.matmul %23, %24, %cst {dimension_numbers = #tpu.dot_dimension_numbers<[1], [0], [0], [1], [0, 0, 1, 1], [], []>} : vector<128x128xf32>, vector<128x8xf32>, vector<128x8xf32> -> vector<128x8xf32>
      %26 = tpu.transpose %25, [1, 0] : vector<128x8xf32> -> vector<8x128xf32>
      %27 = arith.negf %26 : vector<8x128xf32>
      %28 = math.exp %27 : vector<8x128xf32>
      %cst_11 = arith.constant 1.000000e+00 : f32
      %29 = vector.broadcast %cst_11 : f32 to vector<8x128xf32>
      %30 = arith.addf %29, %28 : vector<8x128xf32>
      %31 = arith.divf %29, %30 : vector<8x128xf32>
      %32 = arith.mulf %10, %31 : vector<8x128xf32>
      %c0_12 = arith.constant 0 : index
      %c0_13 = arith.constant 0 : index
      %33 = vector.load %arg5[%c0_12, %c0_13] : memref<8x128xf32, #tpu.memory_space<vmem>>, vector<8x128xf32>
      %cst_14 = arith.constant dense<0.000000e+00> : vector<8x128xf32>
      %34 = tpu.matmul %32, %23, %cst_14 {dimension_numbers = #tpu.dot_dimension_numbers<[1], [0], [0], [1], [0, 0, 1, 1], [], []>} : vector<8x128xf32>, vector<128x128xf32>, vector<8x128xf32> -> vector<8x128xf32>
      %35 = arith.addf %33, %34 : vector<8x128xf32>
      %c0_15 = arith.constant 0 : index
      %c0_16 = arith.constant 0 : index
      %36 = vector.load %arg5[%c0_15, %c0_16] : memref<8x128xf32, #tpu.memory_space<vmem>>, vector<8x128xf32>
      tpu.vector_store %arg5[%c0_15, %c0_16], %35 {strides = array<i32>} : memref<8x128xf32, #tpu.memory_space<vmem>>, vector<8x128xf32>,
    } else {
    }
    return
  }
  func.func @transform_0(%arg0: i32, %arg1: i32) -> (i32, i32) {
    %c1_i32 = arith.constant 1 : i32
    %0 = arith.subi %c1_i32, %arg0 : i32
    %1 = arith.muli %arg1, %0 : i32
    %c0_i32 = arith.constant 0 : i32
    %c0_i32_0 = arith.constant 0 : i32
    return %1, %c0_i32 : i32, i32
  }
  func.func @transform_1(%arg0: i32, %arg1: i32) -> (i32, i32) {
    %c0_i32 = arith.constant 0 : i32
    %c0_i32_0 = arith.constant 0 : i32
    return %c0_i32, %arg1 : i32, i32
  }
  func.func @transform_2(%arg0: i32, %arg1: i32) -> (i32, i32) {
    %c0_i32 = arith.constant 0 : i32
    %c0_i32_0 = arith.constant 0 : i32
    %c0_i32_1 = arith.constant 0 : i32
    return %c0_i32, %c0_i32_0 : i32, i32
  }
  func.func @transform_3(%arg0: i32, %arg1: i32) -> (i32, i32) {
    %c0_i32 = arith.constant 0 : i32
    %c0_i32_0 = arith.constant 0 : i32
    %c0_i32_1 = arith.constant 0 : i32
    return %c0_i32, %c0_i32_0 : i32, i32
  }
}

</mosaic_0001>

<bundles_post_ra>
// kernel: context_based_attention.1
= control target key start
LH: loop header
LB: loop body
LE: loop exit
PB: predicated region body
PF: predicated region fallthrough
CT: control target
= control target key end

     0   :  { %s1184_s12 = smov 0   ;;  %s1186_s13 = smov 0   ;;  %s1456_s0 = inlined_call_operand.vmem [shape: f32[128,128], index: 0, kind: input, shape index: {}]   ;;  %s1457_s1 = inlined_call_operand.vmem [shape: s32[1,128], index: 1, kind: input, shape index: {}]   ;;  %s1458_s2 = inlined_call_operand.vmem [shape: f32[128,128], index: 2, kind: input, shape index: {}]   ;;  %s1459_s3 = inlined_call_operand.vmem [shape: f32[8,128], index: 3, kind: output, shape index: {}]  }
   0x1   :  { %s1188_s14 = smov 0  }
   0x2 LB: > { %s25_s15 = sadd.s32 1, %s1150_s13  ;;  %p836_p0 = scmp.ge.s32.totalorder %s1154_s14, 1  ;;  %s1154_s14 = sphi %s1188_s14, %s13_s14   ;;  %s1150_s13 = sphi %s1186_s13, %s1461_s13   ;;  %s1146_s12 = sphi %s1184_s12, %s1460_s12  }
   0x3   : > { %p27_p1 = scmp.ge.s32.totalorder %s25_s15, 2  ;;  %p161_p2 = scmp.lt.s32.totalorder %s1154_s14, 3 }
   0x5   : > { %s1463_s15 = smov (%p27_p1, %s25_s15), 0  ;;  %p162_p3 = pnand %p836_p0, %p161_p2 }
   0x6   : > { %p198_p4 = scmp.eq.s32.totalorder (!%p162_p3), %s1146_s12, 0 }
   0x7   : > { %165 = sbr.rel (%p162_p3) target bundleno = 1385 (0x569), region = 32 }
   0xc   : > { %203 = sbr.rel (!%p198_p4) target bundleno = 17 (0x11), region = 36  ;;  %vm205_vm0 = vcmask (%p198_p4), 7168   ;;  %v1156_v0 = vmov (%p198_p4), 0.0  }
   0xd   : > { %204 = vst [vmem:[#allocation2] sm:$0xff] (%p198_p4), %v1156_v0  ;;  %207 = vst [vmem:[%s1459_s3] sm:$0xff] (%p198_p4), %v1156_v0 }
   0xe   : > { %206 = vst.msk [vmem:[#allocation3] sm:$0xff] (%p198_p4), %vm205_vm0, %v1156_v0 }
  0x11 PF: > { %v208_v1 = vlaneseq  ;;  %v1211_v2 = vld [vmem:[%s1457_s1] ss:$0 sm:$0xff]  ;;  %v1157_v4 = vmov 0.0   ;;  %p840_p5 = scmp.ne.s32.totalorder %s1146_s12, 0 }
  0x13   : > { %v1213_v3 = vshrl.u32 %v208_v1, 7  ;;  %220 = sbr.rel (%p840_p5) target bundleno = 253 (0xfd), region = 40 }
  0x15   : > { %vm215_vm1 = vcmp.eq.s32.totalorder %v1211_v2, %v1213_v3 }
  0x16   : > { %v1220_v5 = vsel %vm215_vm1, 1.0, %v1157_v4 }
  0x18   : > { %v236_v6 = vld [vmem:[%s1456_s0 + $0x78] sm:$0xff]  ;;  %v235_v7 = vld [vmem:[%s1456_s0 + $0x70] sm:$0xff]  ;;  %v234_v8 = vld [vmem:[%s1456_s0 + $0x68] sm:$0xff]  ;;  %311 = vadd.xlane.f32.xlu0 %v1220_v5  ;;  %v1158_v9 = vmov 0.0   ;;  %vm1159_vm2 = vmmov 0   ;;  %v1160_v23 = vmov 1.0  }
  0x19   : > { %930 = vmatprep.subr.mxu0 %v1158_v9  ;;  %333 = vst [vmem:[#allocation5 + $0x28] sm:$0xff] %v236_v6  ;;  %332 = vst [vmem:[#allocation5 + $0x78] sm:$0xff] %v235_v7  ;;  %v233_v10 = vld [vmem:[%s1456_s0 + $0x60] sm:$0xff]  ;;  %v232_v11 = vld [vmem:[%s1456_s0 + $0x58] sm:$0xff]  ;;  %962 = vmatprep.mubr.msk.f32.mxu0 %vm1159_vm2, %v1158_v9  ;;  %vm314_vm3 = vcmask 7168  }
  0x1a   : > { %331 = vst [vmem:[#allocation5 + $0x70] sm:$0xff] %v234_v8  ;;  %v231_v12 = vld [vmem:[%s1456_s0 + $0x50] sm:$0xff]  ;;  %931 = vmatpush3.msra.mxu0 %v236_v6  ;;  %330 = vst [vmem:[#allocation5 + $0x60] sm:$0xff] %v233_v10  ;;  %v230_v13 = vld [vmem:[%s1456_s0 + $0x48] sm:$0xff] }
  0x1b   : > { %329 = vst [vmem:[#allocation5 + $0x38] sm:$0xff] %v232_v11  ;;  %328 = vst [vmem:[#allocation5 + $0x10] sm:$0xff] %v231_v12  ;;  %v229_v14 = vld [vmem:[%s1456_s0 + $0x40] sm:$0xff]  ;;  %v228_v15 = vld [vmem:[%s1456_s0 + $0x38] sm:$0xff]  ;;  %932 = vmatprep.subr.mxu0 %v1158_v9 }
  0x1c   : > { %327 = vst [vmem:[#allocation5 + $0x20] sm:$0xff] %v230_v13  ;;  %326 = vst [vmem:[#allocation5 + $0x40] sm:$0xff] %v229_v14  ;;  %v227_v16 = vld [vmem:[%s1456_s0 + $0x30] sm:$0xff]  ;;  %v226_v17 = vld [vmem:[%s1456_s0 + $0x28] sm:$0xff]  ;;  %933 = vmatpush3.msra.mxu0 %v235_v7 }
  0x1d   : > { %325 = vst [vmem:[#allocation5 + $0x48] sm:$0xff] %v228_v15  ;;  %v225_v18 = vld [vmem:[%s1456_s0 + $0x20] sm:$0xff]  ;;  %324 = vst [vmem:[#allocation5 + $0x8] sm:$0xff] %v227_v16  ;;  %v224_v19 = vld [vmem:[%s1456_s0 + $0x18] sm:$0xff]  ;;  %934 = vmatprep.subr.mxu0 %v1158_v9 }
  0x1e   : > { %323 = vst [vmem:[#allocation5 + $0x68] sm:$0xff] %v226_v17  ;;  %322 = vst [vmem:[#allocation5 + $0x50] sm:$0xff] %v225_v18  ;;  %v223_v20 = vld [vmem:[%s1456_s0 + $0x10] sm:$0xff]  ;;  %v222_v21 = vld [vmem:[%s1456_s0 + $0x8] sm:$0xff]  ;;  %935 = vmatpush3.msra.mxu0 %v234_v8 }
  0x1f   : > { %321 = vst [vmem:[#allocation5 + $0x18] sm:$0xff] %v224_v19  ;;  %320 = vst [vmem:[#allocation5 + $0x58] sm:$0xff] %v223_v20  ;;  %v221_v22 = vld [vmem:[%s1456_s0] sm:$0xff]  ;;  %936 = vmatprep.subr.mxu0 %v1158_v9  ;;  %v310_v24 = vld [vmem:[#allocation3] sm:$0xff] }
  0x20   : > { %319 = vst [vmem:[#allocation5] sm:$0xff] %v222_v21  ;;  %318 = vst [vmem:[#allocation5 + $0x30] sm:$0xff] %v221_v22  ;;  %937 = vmatpush3.msra.mxu0 %v233_v10  ;;  %v237_v27 = vld [vmem:[#allocation2] sm:$0xff] }
  0x21   : > { %938 = vmatprep.subr.mxu0 %v1158_v9 }
  0x22   : > { %939 = vmatpush3.msra.mxu0 %v232_v11 }
  0x23   : > { %940 = vmatprep.subr.mxu0 %v1158_v9 }
  0x24   : > { %941 = vmatpush3.msra.mxu0 %v231_v12 }
  0x25   : > { %942 = vmatprep.subr.mxu0 %v1158_v9 }
  0x26   : > { %943 = vmatpush3.msra.mxu0 %v230_v13 }
  0x27   : > { %944 = vmatprep.subr.mxu0 %v1158_v9 }
  0x28   : > { %945 = vmatpush3.msra.mxu0 %v229_v14 }
  0x29   : > { %946 = vmatprep.subr.mxu0 %v1158_v9 }
  0x2a   : > { %947 = vmatpush3.msra.mxu0 %v228_v15 }
  0x2b   : > { %948 = vmatprep.subr.mxu0 %v1158_v9 }
  0x2c   : > { %949 = vmatpush3.msra.mxu0 %v227_v16 }
  0x2d   : > { %950 = vmatprep.subr.mxu0 %v1158_v9 }
  0x2e   : > { %951 = vmatpush3.msra.mxu0 %v226_v17 }
  0x2f   : > { %952 = vmatprep.subr.mxu0 %v1158_v9 }
  0x30   : > { %953 = vmatpush3.msra.mxu0 %v225_v18 }
  0x31   : > { %954 = vmatprep.subr.mxu0 %v1158_v9 }
  0x32   : > { %955 = vmatpush3.msra.mxu0 %v224_v19 }
  0x33   : > { %956 = vmatprep.subr.mxu0 %v1158_v9 }
  0x34   : > { %957 = vmatpush3.msra.mxu0 %v223_v20 }
  0x35   : > { %958 = vmatprep.subr.mxu0 %v1158_v9 }
  0x36   : > { %959 = vmatpush3.msra.mxu0 %v222_v21 }
  0x37   : > { %960 = vmatprep.subr.mxu0 %v1158_v9 }
  0x38   : > { %961 = vmatpush3.msra.mxu0 %v221_v22 }
  0x39   : > { %963 = vmatmul.mubr.msk.f32.vlgmr.msra.gmra.mxu0 %vm215_vm1, %v1160_v23 }
  0xa1   : > { %v312_v25 = vpop.xlane.xlu0 %311 }
  0xa2   : > { %v313_v26 = vadd.f32 %v312_v25, %v310_v24 }
  0xa4   : > { %315 = vst.msk [vmem:[#allocation3] sm:$0xff] %vm314_vm3, %v313_v26 }
  0xf9   : > { %v304_v28 = vpop.f32.mrf.mxu0 }
  0xfa   : > { %v308_v29 = vadd.f32 %v304_v28, %v237_v27 }
  0xfb   : > { %v964_v30 = vpop.f32.mrf.mxu0 }
  0xfc   : > { %309 = vst [vmem:[#allocation2] sm:$0xff] %v308_v29 }
  0xfd PF: > { %p842_p6 = scmp.ne.s32.totalorder %s1146_s12, 1 }
  0xff   : > { %337 = sbr.rel (%p842_p6) target bundleno = 1385 (0x569), region = 44 }
 0x104   : > { %v342_v31 = vld [vmem:[#allocation3] sm:$0xff]  ;;  %v366_v32 = vld [vmem:[%s1458_s2 + $0x78] sm:$0xff]  ;;  %v1161_v33 = vmov 0   ;;  %v1162_v35 = vmov 0.0   ;;  %v365_v36 = vld [vmem:[%s1458_s2 + $0x70] sm:$0xff]  ;;  %vm1163_vm4 = vmmov 0  }
 0x105   : > { %1123 = vset.pattern.permute.xlu0 %v1161_v33  ;;  %v343_v34 = vmax.f32 %v342_v31, 1.0  ;;  %965 = vmatprep.subr.mxu0 %v1162_v35  ;;  %v364_v37 = vld [vmem:[%s1458_s2 + $0x68] sm:$0xff]  ;;  %v363_v38 = vld [vmem:[%s1458_s2 + $0x60] sm:$0xff]  ;;  %v362_v39 = vld [vmem:[%s1458_s2 + $0x58] sm:$0xff]  ;;  %vm470_vm5 = vcmask 64512  }
 0x106   : > { %966 = vmatpush3.msra.mxu0 %v366_v32  ;;  %997 = vmatprep.mubr.msk.f32.mxu0 %vm1163_vm4, %v1162_v35  ;;  %v361_v40 = vld [vmem:[%s1458_s2 + $0x50] sm:$0xff]  ;;  %v360_v41 = vld [vmem:[%s1458_s2 + $0x48] sm:$0xff]  ;;  %v359_v42 = vld [vmem:[%s1458_s2 + $0x40] sm:$0xff] }
 0x107   : > { %346 = vperm.xlu0 %1123, %v343_v34   ;;  %967 = vmatprep.subr.mxu0 %v1162_v35  ;;  %v358_v43 = vld [vmem:[%s1458_s2 + $0x38] sm:$0xff]  ;;  %v357_v44 = vld [vmem:[%s1458_s2 + $0x30] sm:$0xff]  ;;  %v356_v45 = vld [vmem:[%s1458_s2 + $0x28] sm:$0xff] }
 0x108   : > { %968 = vmatpush3.msra.mxu0 %v365_v36  ;;  %v355_v46 = vld [vmem:[%s1458_s2 + $0x20] sm:$0xff]  ;;  %v354_v47 = vld [vmem:[%s1458_s2 + $0x18] sm:$0xff]  ;;  %v353_v48 = vld [vmem:[%s1458_s2 + $0x10] sm:$0xff] }
 0x109   : > { %969 = vmatprep.subr.mxu0 %v1162_v35  ;;  %v352_v49 = vld [vmem:[%s1458_s2 + $0x8] sm:$0xff]  ;;  %v351_v50 = vld [vmem:[%s1458_s2] sm:$0xff]  ;;  %v1348_v59 = vld [vmem:[#allocation5 + $0x28] sm:$0xff] }
 0x10a   : > { %970 = vmatpush3.msra.mxu0 %v364_v37  ;;  %v341_v52 = vld [vmem:[#allocation2] sm:$0xff]  ;;  %v1351_v61 = vld [vmem:[#allocation5 + $0x78] sm:$0xff]  ;;  %v1360_v0 = vld [vmem:[#allocation5 + $0x60] sm:$0xff] }
 0x10b   : > { %971 = vmatprep.subr.mxu0 %v1162_v35  ;;  %v1345_v58 = vld [vmem:[#allocation5 + $0x30] sm:$0xff]  ;;  %v1365_v1 = vld [vmem:[#allocation5 + $0x38] sm:$0xff]  ;;  %v1374_v4 = vld [vmem:[#allocation5 + $0x20] sm:$0xff] }
 0x10c   : > { %972 = vmatpush3.msra.mxu0 %v363_v38  ;;  %1032 = vmatprep.mubr.f32.mxu1 %v1345_v58  ;;  %v1356_v62 = vld [vmem:[#allocation5 + $0x70] sm:$0xff]  ;;  %v1378_v7 = vld [vmem:[#allocation5 + $0x40] sm:$0xff]  ;;  %v1383_v8 = vld [vmem:[#allocation5 + $0x48] sm:$0xff] }
 0x10d   : > { %973 = vmatprep.subr.mxu0 %v1162_v35  ;;  %v1369_v3 = vld [vmem:[#allocation5 + $0x10] sm:$0xff]  ;;  %v1387_v10 = vld [vmem:[#allocation5 + $0x8] sm:$0xff]  ;;  %v1401_v14 = vld [vmem:[#allocation5 + $0x18] sm:$0xff] }
 0x10e   : > { %974 = vmatpush3.msra.mxu0 %v362_v39  ;;  %v1392_v11 = vld [vmem:[#allocation5 + $0x68] sm:$0xff]  ;;  %v1396_v13 = vld [vmem:[#allocation5 + $0x50] sm:$0xff]  ;;  %v1405_v16 = vld [vmem:[#allocation5 + $0x58] sm:$0xff] }
 0x10f   : > { %975 = vmatprep.subr.mxu0 %v1162_v35  ;;  %v1410_v17 = vld [vmem:[#allocation5] sm:$0xff] }
 0x110   : > { %976 = vmatpush3.msra.mxu0 %v361_v40 }
 0x111   : > { %977 = vmatprep.subr.mxu0 %v1162_v35 }
 0x112   : > { %978 = vmatpush3.msra.mxu0 %v360_v41 }
 0x113   : > { %979 = vmatprep.subr.mxu0 %v1162_v35 }
 0x114   : > { %980 = vmatpush3.msra.mxu0 %v359_v42 }
 0x115   : > { %981 = vmatprep.subr.mxu0 %v1162_v35 }
 0x116   : > { %982 = vmatpush3.msra.mxu0 %v358_v43 }
 0x117   : > { %983 = vmatprep.subr.mxu0 %v1162_v35 }
 0x118   : > { %984 = vmatpush3.msra.mxu0 %v357_v44 }
 0x119   : > { %985 = vmatprep.subr.mxu0 %v1162_v35 }
 0x11a   : > { %986 = vmatpush3.msra.mxu0 %v356_v45 }
 0x11b   : > { %987 = vmatprep.subr.mxu0 %v1162_v35 }
 0x11c   : > { %988 = vmatpush3.msra.mxu0 %v355_v46 }
 0x11d   : > { %989 = vmatprep.subr.mxu0 %v1162_v35 }
 0x11e   : > { %990 = vmatpush3.msra.mxu0 %v354_v47 }
 0x11f   : > { %991 = vmatprep.subr.mxu0 %v1162_v35 }
 0x120   : > { %992 = vmatpush3.msra.mxu0 %v353_v48 }
 0x121   : > { %993 = vmatprep.subr.mxu0 %v1162_v35 }
 0x122   : > { %994 = vmatpush3.msra.mxu0 %v352_v49 }
 0x123   : > { %995 = vmatprep.subr.mxu0 %v1162_v35 }
 0x124   : > { %996 = vmatpush3.msra.mxu0 %v351_v50 }
 0x125   : > { %1056 = vmatprep.subr.mxu0 %v1162_v35 }
 0x182   : > { %v347_v51 = vpop.permute.xlu0 %346 }
 0x183   : > { %1124 = vrcp.f32 %v347_v51 }
 0x190   : > { %v1125_v53 = vpop.eup %1124 }
 0x191   : > { %v350_v54 = vmul.f32 %v1125_v53, %v341_v52 }
 0x193   : > { %998 = vmatmul.mubr.f32.vlgmr.msra.gmra.mxu0 %v350_v54 }
 0x194   : > { %1088 = vmatprep.mubr.msk.f32.mxu0 %vm1163_vm4, %v1162_v35  ;;  %1057 = vmatpush3.msra.mxu0 %v1348_v59 }
 0x195   : > { %1058 = vmatprep.subr.mxu0 %v1162_v35 }
 0x196   : > { %1059 = vmatpush3.msra.mxu0 %v1351_v61 }
 0x197   : > { %1060 = vmatprep.subr.mxu0 %v1162_v35 }
 0x198   : > { %1061 = vmatpush3.msra.mxu0 %v1356_v62 }
 0x199   : > { %1062 = vmatprep.subr.mxu0 %v1162_v35 }
 0x19a   : > { %1063 = vmatpush3.msra.mxu0 %v1360_v0 }
 0x19b   : > { %1064 = vmatprep.subr.mxu0 %v1162_v35 }
 0x19c   : > { %1065 = vmatpush3.msra.mxu0 %v1365_v1 }
 0x19d   : > { %1066 = vmatprep.subr.mxu0 %v1162_v35 }
 0x19e   : > { %1067 = vmatpush3.msra.mxu0 %v1369_v3 }
 0x19f   : > { %1068 = vmatprep.subr.mxu0 %v1162_v35 }
 0x1a0   : > { %1069 = vmatpush3.msra.mxu0 %v1374_v4 }
 0x1a1   : > { %1070 = vmatprep.subr.mxu0 %v1162_v35 }
 0x1a2   : > { %1071 = vmatpush3.msra.mxu0 %v1378_v7 }
 0x1a3   : > { %1072 = vmatprep.subr.mxu0 %v1162_v35 }
 0x1a4   : > { %1073 = vmatpush3.msra.mxu0 %v1383_v8 }
 0x1a5   : > { %1074 = vmatprep.subr.mxu0 %v1162_v35 }
 0x1a6   : > { %1075 = vmatpush3.msra.mxu0 %v1387_v10 }
 0x1a7   : > { %1076 = vmatprep.subr.mxu0 %v1162_v35 }
 0x1a8   : > { %1077 = vmatpush3.msra.mxu0 %v1392_v11 }
 0x1a9   : > { %1078 = vmatprep.subr.mxu0 %v1162_v35 }
 0x1aa   : > { %1079 = vmatpush3.msra.mxu0 %v1396_v13 }
 0x1ab   : > { %1080 = vmatprep.subr.mxu0 %v1162_v35 }
 0x1ac   : > { %1081 = vmatpush3.msra.mxu0 %v1401_v14 }
 0x1ad   : > { %1082 = vmatprep.subr.mxu0 %v1162_v35 }
 0x1ae   : > { %1083 = vmatpush3.msra.mxu0 %v1405_v16 }
 0x1af   : > { %1084 = vmatprep.subr.mxu0 %v1162_v35 }
 0x1b0   : > { %1085 = vmatpush3.msra.mxu0 %v1410_v17 }
 0x1b1   : > { %1086 = vmatprep.subr.mxu0 %v1162_v35 }
 0x1b2   : > { %1087 = vmatpush3.msra.mxu0 %v1345_v58 }
 0x253   : > { %v433_v55 = vpop.f32.mrf.mxu0 }
 0x254   : > { %1126 = vtanh.f32 %v433_v55 }
 0x255   : > { %v999_v56 = vpop.f32.mrf.mxu0 }
 0x261   : > { %v1127_v57 = vpop.eup %1126 }
 0x262   : > { %438 = vxpose.xlu0.b32.start.end [1/1] (short) %v1127_v57, 128 }
 0x2de   : > { %v454_v60 = vpop.trf.xlu0 }
 0x2df   : > { %471 = vst.msk [vmem:[#allocation4] sm:$0xff] %vm470_vm5, %v454_v60 }
 0x2e2   : > { %v455_v63 = vpop.trf.xlu0 }
 0x2e3   : > { %472 = vst.msk [vmem:[#allocation4 + $0x8] sm:$0xff] %vm470_vm5, %v455_v63 }
 0x2e6   : > { %v456_v2 = vpop.trf.xlu0  ;;  %v505_v42 = vld [vmem:[#allocation4] sm:$0xff] }
 0x2e7   : > { %473 = vst.msk [vmem:[#allocation4 + $0x10] sm:$0xff] %vm470_vm5, %v456_v2 }
 0x2ea   : > { %v457_v6 = vpop.trf.xlu0  ;;  %v506_v41 = vld [vmem:[#allocation4 + $0x8] sm:$0xff] }
 0x2eb   : > { %474 = vst.msk [vmem:[#allocation4 + $0x18] sm:$0xff] %vm470_vm5, %v457_v6 }
 0x2ee   : > { %v458_v9 = vpop.trf.xlu0  ;;  %v507_v40 = vld [vmem:[#allocation4 + $0x10] sm:$0xff] }
 0x2ef   : > { %475 = vst.msk [vmem:[#allocation4 + $0x20] sm:$0xff] %vm470_vm5, %v458_v9 }
 0x2f2   : > { %v459_v12 = vpop.trf.xlu0  ;;  %v508_v39 = vld [vmem:[#allocation4 + $0x18] sm:$0xff] }
 0x2f3   : > { %476 = vst.msk [vmem:[#allocation4 + $0x28] sm:$0xff] %vm470_vm5, %v459_v12 }
 0x2f6   : > { %v460_v15 = vpop.trf.xlu0  ;;  %v509_v38 = vld [vmem:[#allocation4 + $0x20] sm:$0xff] }
 0x2f7   : > { %477 = vst.msk [vmem:[#allocation4 + $0x30] sm:$0xff] %vm470_vm5, %v460_v15 }
 0x2fa   : > { %v461_v18 = vpop.trf.xlu0  ;;  %v510_v37 = vld [vmem:[#allocation4 + $0x28] sm:$0xff] }
 0x2fb   : > { %478 = vst.msk [vmem:[#allocation4 + $0x38] sm:$0xff] %vm470_vm5, %v461_v18 }
 0x2fe   : > { %v462_v19 = vpop.trf.xlu0  ;;  %v511_v36 = vld [vmem:[#allocation4 + $0x30] sm:$0xff] }
 0x2ff   : > { %479 = vst.msk [vmem:[#allocation4 + $0x40] sm:$0xff] %vm470_vm5, %v462_v19 }
 0x302   : > { %v463_v20 = vpop.trf.xlu0  ;;  %v512_v35 = vld [vmem:[#allocation4 + $0x38] sm:$0xff] }
 0x303   : > { %480 = vst.msk [vmem:[#allocation4 + $0x48] sm:$0xff] %vm470_vm5, %v463_v20 }
 0x306   : > { %v464_v21 = vpop.trf.xlu0  ;;  %v513_v34 = vld [vmem:[#allocation4 + $0x40] sm:$0xff] }
 0x307   : > { %481 = vst.msk [vmem:[#allocation4 + $0x50] sm:$0xff] %vm470_vm5, %v464_v21 }
 0x30a   : > { %v465_v22 = vpop.trf.xlu0  ;;  %v514_v33 = vld [vmem:[#allocation4 + $0x48] sm:$0xff] }
 0x30b   : > { %482 = vst.msk [vmem:[#allocation4 + $0x58] sm:$0xff] %vm470_vm5, %v465_v22 }
 0x30e   : > { %v466_v23 = vpop.trf.xlu0  ;;  %v515_v32 = vld [vmem:[#allocation4 + $0x50] sm:$0xff] }
 0x30f   : > { %483 = vst.msk [vmem:[#allocation4 + $0x60] sm:$0xff] %vm470_vm5, %v466_v23 }
 0x312   : > { %v467_v24 = vpop.trf.xlu0  ;;  %v516_v31 = vld [vmem:[#allocation4 + $0x58] sm:$0xff] }
 0x313   : > { %484 = vst.msk [vmem:[#allocation4 + $0x68] sm:$0xff] %vm470_vm5, %v467_v24 }
 0x316   : > { %v468_v25 = vpop.trf.xlu0  ;;  %v517_v30 = vld [vmem:[#allocation4 + $0x60] sm:$0xff] }
 0x317   : > { %485 = vst.msk [vmem:[#allocation4 + $0x70] sm:$0xff] %vm470_vm5, %v468_v25 }
 0x31a   : > { %v469_v26 = vpop.trf.xlu0  ;;  %v518_v29 = vld [vmem:[#allocation4 + $0x68] sm:$0xff] }
 0x31b   : > { %486 = vst.msk [vmem:[#allocation4 + $0x78] sm:$0xff] %vm470_vm5, %v469_v26 }
 0x31e   : > { %v519_v28 = vld [vmem:[#allocation4 + $0x70] sm:$0xff] }
 0x322   : > { %v520_v27 = vld [vmem:[#allocation4 + $0x78] sm:$0xff] }
 0x323   : > { %1000 = vmatprep.subr.mxu1 %v520_v27 }
 0x324   : > { %1001 = vmatpush3.msra.mxu1 %v520_v27 }
 0x325   : > { %1002 = vmatprep.subr.mxu1 %v519_v28 }
 0x326   : > { %1003 = vmatpush3.msra.mxu1 %v519_v28 }
 0x327   : > { %1004 = vmatprep.subr.mxu1 %v518_v29 }
 0x328   : > { %1005 = vmatpush3.msra.mxu1 %v518_v29 }
 0x329   : > { %1006 = vmatprep.subr.mxu1 %v517_v30 }
 0x32a   : > { %1007 = vmatpush3.msra.mxu1 %v517_v30 }
 0x32b   : > { %1008 = vmatprep.subr.mxu1 %v516_v31 }
 0x32c   : > { %1009 = vmatpush3.msra.mxu1 %v516_v31 }
 0x32d   : > { %1010 = vmatprep.subr.mxu1 %v515_v32 }
 0x32e   : > { %1011 = vmatpush3.msra.mxu1 %v515_v32 }
 0x32f   : > { %1012 = vmatprep.subr.mxu1 %v514_v33 }
 0x330   : > { %1013 = vmatpush3.msra.mxu1 %v514_v33 }
 0x331   : > { %1014 = vmatprep.subr.mxu1 %v513_v34 }
 0x332   : > { %1015 = vmatpush3.msra.mxu1 %v513_v34 }
 0x333   : > { %1016 = vmatprep.subr.mxu1 %v512_v35 }
 0x334   : > { %1017 = vmatpush3.msra.mxu1 %v512_v35 }
 0x335   : > { %1018 = vmatprep.subr.mxu1 %v511_v36 }
 0x336   : > { %1019 = vmatpush3.msra.mxu1 %v511_v36 }
 0x337   : > { %1020 = vmatprep.subr.mxu1 %v510_v37 }
 0x338   : > { %1021 = vmatpush3.msra.mxu1 %v510_v37 }
 0x339   : > { %1022 = vmatprep.subr.mxu1 %v509_v38 }
 0x33a   : > { %1023 = vmatpush3.msra.mxu1 %v509_v38 }
 0x33b   : > { %1024 = vmatprep.subr.mxu1 %v508_v39 }
 0x33c   : > { %1025 = vmatpush3.msra.mxu1 %v508_v39 }
 0x33d   : > { %1026 = vmatprep.subr.mxu1 %v507_v40 }
 0x33e   : > { %1027 = vmatpush3.msra.mxu1 %v507_v40 }
 0x33f   : > { %1028 = vmatprep.subr.mxu1 %v506_v41 }
 0x340   : > { %1029 = vmatpush3.msra.mxu1 %v506_v41 }
 0x341   : > { %1030 = vmatprep.subr.mxu1 %v505_v42 }
 0x342   : > { %1031 = vmatpush3.msra.mxu1 %v505_v42 }
 0x343   : > { %1033 = vmatmul.mubr.f32.vlgmr.msra.gmra.mxu1 %v1410_v17 }
 0x344   : > { %1035 = vmatprep.mubr.f32.mxu1 %v1405_v16 }
 0x347   : > { %1036 = vmatmul.mubr.f32.gmra.mxu1 %v1401_v14 }
 0x348   : > { %1038 = vmatprep.mubr.f32.mxu1 %v1396_v13 }
 0x34b   : > { %1039 = vmatmul.mubr.f32.gmra.mxu1 %v1392_v11 }
 0x34c   : > { %1041 = vmatprep.mubr.f32.mxu1 %v1387_v10 }
 0x34f   : > { %1042 = vmatmul.mubr.f32.gmra.mxu1 %v1383_v8 }
 0x350   : > { %1044 = vmatprep.mubr.f32.mxu1 %v1378_v7 }
 0x353   : > { %1045 = vmatmul.mubr.f32.gmra.mxu1 %v1374_v4 }
 0x354   : > { %1047 = vmatprep.mubr.f32.mxu1 %v1369_v3 }
 0x357   : > { %1048 = vmatmul.mubr.f32.gmra.mxu1 %v1365_v1  ;;  %v705_v1 = vld [vmem:[%s1459_s3] sm:$0xff] }
 0x358   : > { %1050 = vmatprep.mubr.f32.mxu1 %v1360_v0 }
 0x35b   : > { %1051 = vmatmul.mubr.f32.gmra.mxu1 %v1356_v62 }
 0x35c   : > { %1053 = vmatprep.mubr.f32.mxu1 %v1351_v61 }
 0x35f   : > { %1054 = vmatmul.mubr.f32.gmra.mxu1 %v1348_v59 }
 0x403   : > { %v1034_v43 = vpop.f32.mrf.mxu1 }
 0x405   : > { %v587_v44 = vpop.f32.mrf.mxu1 }
 0x406   : > { %666 = vxpose.xlu1.b32.start [1/16] (narrow) %v587_v44, 8 }
 0x407   : > { %v1037_v45 = vpop.f32.mrf.mxu1 }
 0x409   : > { %v597_v46 = vpop.f32.mrf.mxu1 }
 0x40a   : > { %667 = vxpose.xlu1.b32.cont [2/16] (narrow) %v1034_v43, 8 }
 0x40b   : > { %v1040_v47 = vpop.f32.mrf.mxu1 }
 0x40d   : > { %v607_v48 = vpop.f32.mrf.mxu1 }
 0x40e   : > { %668 = vxpose.xlu1.b32.cont [3/16] (narrow) %v597_v46, 8 }
 0x40f   : > { %v1043_v49 = vpop.f32.mrf.mxu1 }
 0x411   : > { %v617_v50 = vpop.f32.mrf.mxu1 }
 0x412   : > { %669 = vxpose.xlu1.b32.cont [4/16] (narrow) %v1037_v45, 8 }
 0x413   : > { %v1046_v51 = vpop.f32.mrf.mxu1 }
 0x415   : > { %v627_v52 = vpop.f32.mrf.mxu1 }
 0x416   : > { %670 = vxpose.xlu1.b32.cont [5/16] (narrow) %v607_v48, 8 }
 0x417   : > { %v1049_v53 = vpop.f32.mrf.mxu1 }
 0x419   : > { %v637_v54 = vpop.f32.mrf.mxu1 }
 0x41a   : > { %671 = vxpose.xlu1.b32.cont [6/16] (narrow) %v1040_v47, 8 }
 0x41b   : > { %v1052_v55 = vpop.f32.mrf.mxu1 }
 0x41d   : > { %v647_v56 = vpop.f32.mrf.mxu1 }
 0x41e   : > { %672 = vxpose.xlu1.b32.cont [7/16] (narrow) %v617_v50, 8 }
 0x41f   : > { %v1055_v57 = vpop.f32.mrf.mxu1 }
 0x421   : > { %v657_v58 = vpop.f32.mrf.mxu1 }
 0x422   : > { %673 = vxpose.xlu1.b32.cont [8/16] (narrow) %v1043_v49, 8 }
 0x426   : > { %674 = vxpose.xlu1.b32.cont [9/16] (narrow) %v627_v52, 8 }
 0x42a   : > { %675 = vxpose.xlu1.b32.cont [10/16] (narrow) %v1046_v51, 8 }
 0x42e   : > { %676 = vxpose.xlu1.b32.cont [11/16] (narrow) %v637_v54, 8 }
 0x432   : > { %677 = vxpose.xlu1.b32.cont [12/16] (narrow) %v1049_v53, 8 }
 0x436   : > { %678 = vxpose.xlu1.b32.cont [13/16] (narrow) %v647_v56, 8 }
 0x43a   : > { %679 = vxpose.xlu1.b32.cont [14/16] (narrow) %v1052_v55, 8 }
 0x43e   : > { %680 = vxpose.xlu1.b32.cont [15/16] (narrow) %v657_v58, 8 }
 0x442   : > { %681 = vxpose.xlu1.b32.end [16/16] (narrow) %v1055_v57, 8 }
 0x482   : > { %v682_v59 = vpop.trf.xlu1 }
 0x483   : > { %v843_v60 = vmul.f32 -1.442695, %v682_v59 }
 0x485   : > { %1128 = vpow2.f32 %v843_v60 }
 0x492   : > { %v1129_v61 = vpop.eup %1128 }
 0x493   : > { %v701_v62 = vadd.f32 1.0, %v1129_v61 }
 0x495   : > { %1130 = vrcp.f32 %v701_v62 }
 0x4a2   : > { %v1131_v63 = vpop.eup %1130 }
 0x4a3   : > { %v704_v0 = vmul.f32 %v1131_v63, %v1220_v5 }
 0x4a5   : > { %1089 = vmatmul.mubr.f32.vlgmr.msra.gmra.mxu0 %v704_v0 }
 0x565   : > { %v772_v2 = vpop.f32.mrf.mxu0 }
 0x566   : > { %v776_v3 = vadd.f32 %v772_v2, %v705_v1 }
 0x567   : > { %v1090_v4 = vpop.f32.mrf.mxu0 }
 0x568   : > { %777 = vst [vmem:[%s1459_s3] sm:$0xff] %v776_v3 }
 0x569 PF: > { %s13_s14 = sadd.s32 1, %s1154_s14   ;;  %s1460_s12 = smov %s1150_s13 }
 0x56a   : > { %p10_p7 = scmp.ge.s32.totalorder %s13_s14, 4   ;;  %s1461_s13 = smov %s1463_s15 }
 0x56c   :  { %12 = sbr.rel (!%p10_p7) target bundleno = 2 (0x2), region = 79 }

</bundles_post_ra>
